<compile_context>
chip_gen: v6e
topology: v6e:2x2x1
jax: 0.10.0
libtpu: 0.0.40
codegen_flags: <defaults>
</compile_context>

<pallas_src>
import math

import jax
import jax.numpy as jnp
from jax import lax
from jax.experimental import pallas as pl
from jax.experimental.pallas import tpu as pltpu

# Small compatibility shims (these names moved across recent JAX releases).
try:
    _CompilerParams = pltpu.CompilerParams
except AttributeError:  # older jax
    _CompilerParams = pltpu.TPUCompilerParams
try:
    _VMEM = pltpu.MemorySpace.VMEM
except AttributeError:  # older jax
    _VMEM = pltpu.TPUMemorySpace.VMEM


def mlp_kernel(x_ref, w1_ref, b1_ref, w2_ref, b2_ref, w3t_ref, b3_ref, out_ref):
    # fc1 + ReLU: (TM, K) @ (K, 256) -> (TM, 256), f32 accumulation on the MXU.
    h1 = jnp.dot(x_ref[...], w1_ref[...], preferred_element_type=jnp.float32)
    h1 = jnp.maximum(h1 + b1_ref[...], 0.0)
    # fc2 + ReLU: (TM, 256) @ (256, 128) -> (TM, 128)
    h2 = jnp.dot(h1.astype(w2_ref.dtype), w2_ref[...],
                 preferred_element_type=jnp.float32)
    h2 = jnp.maximum(h2 + b2_ref[...], 0.0)
    # fc3, written lane-dense: contract the 128-wide hidden dim of h2 against
    # w3 stored as a (1, 128) row -> (1, TM); batch lives on the lane axis so
    # the final store is a full-width (unmasked) vst.
    out = lax.dot_general(
        w3t_ref[...], h2.astype(w3t_ref.dtype),
        dimension_numbers=(((1,), (1,)), ((), ())),
        preferred_element_type=jnp.float32)
    out_ref[...] = (out + b3_ref[...]).astype(out_ref.dtype)


def mlp_regression_forward(x, params, *, compute_dtype=jnp.float32):
    """x: (batch, input_dim) float32 -> (batch, 1) float32.

    params = (w1, b1, w2, b2, w3, b3) with w_i shaped (in, out) (pre-transposed
    vs. torch.nn.Linear.weight) and b_i shaped (1, out).
    """
    w1, b1, w2, b2, w3, b3 = params
    batch, in_dim = x.shape
    h1_dim, h2_dim = w1.shape[1], w2.shape[1]

    # ---- host-side layout prep (one-time / XLA ops, outside the kernel) ----
    # Lane-align K: pad the 86-wide feature dim up to a multiple of 128.
    K = max(128, ((in_dim + 127) // 128) * 128)
    # Batch tile: 256 rows feeds the 2x256 MXU (v6e/v7x); 128 for tiny batches.
    # Per-step VMEM: x tile (TM*K*4B, double-buffered) + ~260 KB resident
    # weights -- far below the 16 MiB (v5e) / 32 MiB (v6e/v7x) scoped limits.
    TM = 256 if batch > 128 else 128
    batch_p = ((batch + TM - 1) // TM) * TM

    x_p = jnp.pad(x.astype(compute_dtype),
                  ((0, batch_p - batch), (0, K - in_dim)))
    w1_p = jnp.pad(w1.astype(compute_dtype), ((0, K - in_dim), (0, 0)))
    w2_c = w2.astype(compute_dtype)
    w3t = w3.astype(compute_dtype).T                 # (1, h2_dim) row
    b1_f = b1.astype(jnp.float32)
    b2_f = b2.astype(jnp.float32)
    b3_f = b3.reshape(1, 1).astype(jnp.float32)

    grid = (batch_p // TM,)

    def resident(shape):
        # Whole-array block with a constant index_map -> block index never
        # changes, so weights/biases stay VMEM-resident across all grid steps.
        return pl.BlockSpec(shape, lambda i: (0,) * len(shape), memory_space=_VMEM)

    out_row = pl.pallas_call(
        mlp_kernel,
        out_shape=jax.ShapeDtypeStruct((1, batch_p), jnp.float32),
        grid=grid,
        in_specs=[
            pl.BlockSpec((TM, K), lambda i: (i, 0), memory_space=_VMEM),  # x tile
            resident((K, h1_dim)),        # w1 (K padded)
            resident((1, h1_dim)),        # b1
            resident((h1_dim, h2_dim)),   # w2
            resident((1, h2_dim)),        # b2
            resident((1, h2_dim)),        # w3^T as a row
            resident((1, 1)),             # b3
        ],
        out_specs=pl.BlockSpec((1, TM), lambda i: (0, i), memory_space=_VMEM),
        compiler_params=_CompilerParams(dimension_semantics=("parallel",)),
    )(x_p, w1_p, b1_f, w2_c, b2_f, w3t, b3_f)

    # (1, batch_p) lane-dense row -> (batch, 1) column expected by the module.
    return out_row[0, :batch].reshape(batch, 1)


def init_params(key, input_dim=86):
    """Deterministic init mimicking torch.nn.Linear default (uniform +-1/sqrt(fan_in))."""
    dims = [(input_dim, 256), (256, 128), (128, 1)]
    params = []
    for i, (fan_in, fan_out) in enumerate(dims):
        kw, kb = jax.random.split(jax.random.fold_in(key, i))
        bound = 1.0 / math.sqrt(fan_in)
        w = jax.random.uniform(kw, (fan_in, fan_out), jnp.float32, -bound, bound)
        b = jax.random.uniform(kb, (1, fan_out), jnp.float32, -bound, bound)
        params += [w, b]
    return tuple(params)


def reference_forward(x, params):
    w1, b1, w2, b2, w3, b3 = params
    h1 = jnp.maximum(x @ w1 + b1, 0.0)
    h2 = jnp.maximum(h1 @ w2 + b2, 0.0)
    return h2 @ w3 + b3


if __name__ == "__main__":
    key = jax.random.PRNGKey(0)
    input_dim = 86
    params = init_params(key, input_dim=input_dim)

    # Small batch (single grid step, TM=128).
    x_small = jax.random.normal(jax.random.fold_in(key, 100), (8, input_dim), jnp.float32)
    out_small = jax.block_until_ready(mlp_regression_forward(x_small, params))
    ref_small = reference_forward(x_small, params)
    assert out_small.shape == (8, 1)
    assert jnp.allclose(out_small, ref_small, atol=1e-4, rtol=1e-4)

    # Larger batch exercising multiple pipelined grid steps (TM=256, grid=(2,)).
    x_big = jax.random.normal(jax.random.fold_in(key, 200), (300, input_dim), jnp.float32)
    out_big = jax.block_until_ready(mlp_regression_forward(x_big, params))
    ref_big = reference_forward(x_big, params)
    assert out_big.shape == (300, 1)
    assert jnp.allclose(out_big, ref_big, atol=1e-4, rtol=1e-4)

    print("KERNEL_OK")
</pallas_src>

<mosaic_0001>
module attributes {stable_mosaic.version = 11 : i64} {
  func.func @mlp_kernel(%arg0: i32, %arg1: memref<128x128xf32, #tpu.memory_space<vmem>>, %arg2: memref<128x256xf32, #tpu.memory_space<vmem>>, %arg3: memref<1x256xf32, #tpu.memory_space<vmem>>, %arg4: memref<256x128xf32, #tpu.memory_space<vmem>>, %arg5: memref<1x128xf32, #tpu.memory_space<vmem>>, %arg6: memref<1x128xf32, #tpu.memory_space<vmem>>, %arg7: memref<1x1xf32, #tpu.memory_space<vmem>>, %arg8: memref<1x128xf32, #tpu.memory_space<vmem>>) attributes {dimension_semantics = [#tpu.dimension_semantics<parallel>], iteration_bounds = array<i64: 1>, scalar_prefetch = 0 : i64, scratch_operands = 0 : i64, tpu.core_type = #tpu.core_type<tc>, window_params = [{transform_indices = @transform_0, window_bounds = array<i64: 128, 128>}, {pipeline_mode = #tpu.pipeline_mode<synchronous>, transform_indices = @transform_1, window_bounds = array<i64: 128, 256>}, {pipeline_mode = #tpu.pipeline_mode<synchronous>, transform_indices = @transform_2, window_bounds = array<i64: 1, 256>}, {pipeline_mode = #tpu.pipeline_mode<synchronous>, transform_indices = @transform_3, window_bounds = array<i64: 256, 128>}, {pipeline_mode = #tpu.pipeline_mode<synchronous>, transform_indices = @transform_4, window_bounds = array<i64: 1, 128>}, {pipeline_mode = #tpu.pipeline_mode<synchronous>, transform_indices = @transform_5, window_bounds = array<i64: 1, 128>}, {pipeline_mode = #tpu.pipeline_mode<synchronous>, transform_indices = @transform_6, window_bounds = array<i64: 1, 1>}, {transform_indices = @transform_7, window_bounds = array<i64: 1, 128>}]} {
    %c0 = arith.constant 0 : index
    %c0_0 = arith.constant 0 : index
    %0 = vector.load %arg1[%c0, %c0_0] : memref<128x128xf32, #tpu.memory_space<vmem>>, vector<128x128xf32>
    %c0_1 = arith.constant 0 : index
    %c0_2 = arith.constant 0 : index
    %1 = vector.load %arg2[%c0_1, %c0_2] : memref<128x256xf32, #tpu.memory_space<vmem>>, vector<128x256xf32>
    %cst = arith.constant dense<0.000000e+00> : vector<128x256xf32>
    %2 = tpu.matmul %0, %1, %cst {dimension_numbers = #tpu.dot_dimension_numbers<[1], [0], [0], [1], [0, 0, 1, 1], [], []>} : vector<128x128xf32>, vector<128x256xf32>, vector<128x256xf32> -> vector<128x256xf32>
    %c0_3 = arith.constant 0 : index
    %c0_4 = arith.constant 0 : index
    %3 = vector.load %arg3[%c0_3, %c0_4] : memref<1x256xf32, #tpu.memory_space<vmem>>, vector<1x256xf32>
    %4 = vector.broadcast %3 : vector<1x256xf32> to vector<128x256xf32>
    %5 = arith.addf %2, %4 : vector<128x256xf32>
    %cst_5 = arith.constant 0.000000e+00 : f32
    %6 = vector.broadcast %cst_5 : f32 to vector<128x256xf32>
    %7 = arith.maximumf %5, %6 : vector<128x256xf32>
    %c0_6 = arith.constant 0 : index
    %c0_7 = arith.constant 0 : index
    %8 = vector.load %arg4[%c0_6, %c0_7] : memref<256x128xf32, #tpu.memory_space<vmem>>, vector<256x128xf32>
    %cst_8 = arith.constant dense<0.000000e+00> : vector<128x128xf32>
    %9 = tpu.matmul %7, %8, %cst_8 {dimension_numbers = #tpu.dot_dimension_numbers<[1], [0], [0], [1], [0, 0, 1, 1], [], []>} : vector<128x256xf32>, vector<256x128xf32>, vector<128x128xf32> -> vector<128x128xf32>
    %c0_9 = arith.constant 0 : index
    %c0_10 = arith.constant 0 : index
    %10 = vector.load %arg5[%c0_9, %c0_10] : memref<1x128xf32, #tpu.memory_space<vmem>>, vector<1x128xf32>
    %11 = vector.broadcast %10 : vector<1x128xf32> to vector<128x128xf32>
    %12 = arith.addf %9, %11 : vector<128x128xf32>
    %cst_11 = arith.constant 0.000000e+00 : f32
    %13 = vector.broadcast %cst_11 : f32 to vector<128x128xf32>
    %14 = arith.maximumf %12, %13 : vector<128x128xf32>
    %c0_12 = arith.constant 0 : index
    %c0_13 = arith.constant 0 : index
    %15 = vector.load %arg6[%c0_12, %c0_13] : memref<1x128xf32, #tpu.memory_space<vmem>>, vector<1x128xf32>
    %cst_14 = arith.constant dense<0.000000e+00> : vector<1x128xf32>
    %16 = tpu.matmul %15, %14, %cst_14 {dimension_numbers = #tpu.dot_dimension_numbers<[1], [1], [0], [0], [0, 0, 1, 0], [], []>} : vector<1x128xf32>, vector<128x128xf32>, vector<1x128xf32> -> vector<1x128xf32>
    %c0_15 = arith.constant 0 : index
    %c0_16 = arith.constant 0 : index
    %17 = vector.load %arg7[%c0_15, %c0_16] : memref<1x1xf32, #tpu.memory_space<vmem>>, vector<1x1xf32>
    %18 = vector.broadcast %17 : vector<1x1xf32> to vector<1x128xf32>
    %19 = arith.addf %16, %18 : vector<1x128xf32>
    %c0_17 = arith.constant 0 : index
    %c0_18 = arith.constant 0 : index
    %20 = vector.load %arg8[%c0_17, %c0_18] : memref<1x128xf32, #tpu.memory_space<vmem>>, vector<1x128xf32>
    tpu.vector_store %arg8[%c0_17, %c0_18], %19 {strides = array<i32>} : memref<1x128xf32, #tpu.memory_space<vmem>>, vector<1x128xf32>,
    return
  }
  func.func @transform_0(%arg0: i32) -> (i32, i32) {
    %c0_i32 = arith.constant 0 : i32
    %c0_i32_0 = arith.constant 0 : i32
    return %arg0, %c0_i32 : i32, i32
  }
  func.func @transform_1(%arg0: i32) -> (i32, i32) {
    %c0_i32 = arith.constant 0 : i32
    %c0_i32_0 = arith.constant 0 : i32
    %c0_i32_1 = arith.constant 0 : i32
    return %c0_i32, %c0_i32_0 : i32, i32
  }
  func.func @transform_2(%arg0: i32) -> (i32, i32) {
    %c0_i32 = arith.constant 0 : i32
    %c0_i32_0 = arith.constant 0 : i32
    %c0_i32_1 = arith.constant 0 : i32
    return %c0_i32, %c0_i32_0 : i32, i32
  }
  func.func @transform_3(%arg0: i32) -> (i32, i32) {
    %c0_i32 = arith.constant 0 : i32
    %c0_i32_0 = arith.constant 0 : i32
    %c0_i32_1 = arith.constant 0 : i32
    return %c0_i32, %c0_i32_0 : i32, i32
  }
  func.func @transform_4(%arg0: i32) -> (i32, i32) {
    %c0_i32 = arith.constant 0 : i32
    %c0_i32_0 = arith.constant 0 : i32
    %c0_i32_1 = arith.constant 0 : i32
    return %c0_i32, %c0_i32_0 : i32, i32
  }
  func.func @transform_5(%arg0: i32) -> (i32, i32) {
    %c0_i32 = arith.constant 0 : i32
    %c0_i32_0 = arith.constant 0 : i32
    %c0_i32_1 = arith.constant 0 : i32
    return %c0_i32, %c0_i32_0 : i32, i32
  }
  func.func @transform_6(%arg0: i32) -> (i32, i32) {
    %c0_i32 = arith.constant 0 : i32
    %c0_i32_0 = arith.constant 0 : i32
    %c0_i32_1 = arith.constant 0 : i32
    return %c0_i32, %c0_i32_0 : i32, i32
  }
  func.func @transform_7(%arg0: i32) -> (i32, i32) {
    %c0_i32 = arith.constant 0 : i32
    %c0_i32_0 = arith.constant 0 : i32
    return %c0_i32, %arg0 : i32, i32
  }
}

</mosaic_0001>

<bundles_post_ra>
// kernel: tpu_custom_call.1
= control target key start
LH: loop header
LB: loop body
LE: loop exit
PB: predicated region body
PF: predicated region fallthrough
CT: control target
= control target key end

     0   :  { %s1040_s0 = inlined_call_operand.hbm [shape: f32[128,128], index: 0, kind: input, shape index: {}]   ;;  %s1041_s1 = inlined_call_operand.hbm [shape: f32[128,256], index: 1, kind: input, shape index: {}]   ;;  %s1042_s2 = inlined_call_operand.vmem [shape: f32[1,256], index: 2, kind: input, shape index: {}]   ;;  %s1043_s3 = inlined_call_operand.hbm [shape: f32[256,128], index: 3, kind: input, shape index: {}]   ;;  %s1044_s4 = inlined_call_operand.vmem [shape: f32[1,128], index: 4, kind: input, shape index: {}]   ;;  %s1045_s5 = inlined_call_operand.vmem [shape: f32[1,128], index: 5, kind: input, shape index: {}]   ;;  %s1046_s6 = inlined_call_operand.<no memory space> [shape: f32[1,1], index: 6, kind: input, shape index: {}]   ;;  %s1047_s7 = inlined_call_operand.hbm [shape: f32[1,128], index: 7, kind: output, shape index: {}]  }
   0x1   :  { %v12_v0 = vstv %s1046_s6 }
   0x2   :  { %13 = vst [vmem:[#allocation2] sm:$0x1] %v12_v0 }
   0x3   :  { %14 = vsyncpa [#allocation4], 0 }
   0x4   :  { %15 = vsyncpa [#allocation7], 0 }
   0x5   :  { %16 = vsyncpa [#allocation5], 0  ;;  %s852_s26 = smov [#allocation6]  }
   0x6   :  { %s34_s27 = sshll.u32 %s852_s26, 4  ;;  %s35_s27 = int_to_ptr.vmem [resolvable:$true] %s34_s27 }
   0x7   :  { %s774_s28 = scalar_lea.vmem %s35_s27, 4096  ;;  %p779_p1 = scmp.lt.s32.totalorder %s35_s27, %s35_s27 }
   0x8   :  { %p775_p0 = scmp.ne.s32.totalorder %s35_s27, %s774_s28  ;;  %p780_p2 = scmp.lt.s32.totalorder %s774_s28, %s774_s28 }
   0xa   :  { %p781_p3 = por %p780_p2, %p779_p1 }
   0xc   :  { %p782_p4 = pnand %p781_p3, %p775_p0 }
   0xe   :  { %785 = shalt.err (!%p782_p4)
}
   0xf   :  { %s853_s29 = smov 256   ;;  %s854_s30 = smov 16  }
  0x10   :  { %40 = dma.hbm_to_vmem [thread:$0]  %s1041_s1, 4096, %s35_s27, [#allocation7], %s853_s29, %s853_s29, %s854_s30  }
  0x11   :  { %s855_s6 = smov [#allocation3]  }
  0x12   :  { %s22_s10 = sshll.u32 %s855_s6, 4  ;;  %s23_s10 = int_to_ptr.vmem [resolvable:$true] %s22_s10 }
  0x13   :  { %s794_s11 = scalar_lea.vmem %s23_s10, 2048  ;;  %p799_p6 = scmp.lt.s32.totalorder %s23_s10, %s23_s10 }
  0x14   :  { %p795_p5 = scmp.ne.s32.totalorder %s23_s10, %s794_s11  ;;  %p800_p7 = scmp.lt.s32.totalorder %s794_s11, %s794_s11 }
  0x16   :  { %p801_p8 = por %p800_p7, %p799_p6 }
  0x18   :  { %p802_p9 = pnand %p801_p8, %p795_p5 }
  0x1a   :  { %805 = shalt.err (!%p802_p9)
}
  0x1b   :  { %s856_s12 = smov 128   ;;  %s857_s13 = smov 8  }
  0x1c   :  { %28 = dma.hbm_to_vmem [thread:$0]  %s1040_s0, 2048, %s23_s10, [#allocation4], %s856_s12, %s856_s12, %s857_s13  }
  0x1d   :  { %s858_s16 = smov [#allocation8]  }
  0x1e   :  { %s48_s17 = sshll.u32 %s858_s16, 4  ;;  %s49_s17 = int_to_ptr.vmem [resolvable:$true] %s48_s17 }
  0x1f   :  { %s814_s1 = scalar_lea.vmem %s49_s17, 4096  ;;  %p819_p11 = scmp.lt.s32.totalorder %s49_s17, %s49_s17 }
  0x20   :  { %p815_p10 = scmp.ne.s32.totalorder %s49_s17, %s814_s1  ;;  %p820_p12 = scmp.lt.s32.totalorder %s814_s1, %s814_s1 }
  0x22   :  { %p821_p13 = por %p820_p12, %p819_p11 }
  0x24   :  { %p822_p0 = pnand %p821_p13, %p815_p10 }
  0x26   :  { %825 = shalt.err (!%p822_p0)
}
  0x27   :  { %54 = dma.hbm_to_vmem [thread:$0]  %s1043_s3, 4096, %s49_s17, [#allocation7], %s856_s12, %s856_s12, %s857_s13  }
  0x28   :  { %846 = dma.done.wait [#allocation4], 2048  }
  0x29   :  { %847 = vsyncadd [#allocation4], 4294965248 }
  0x2a   :  { %848 = dma.done.wait [#allocation7], 8192  }
  0x2b   :  { %849 = vsyncadd [#allocation7], 4294959104  ;;  %v859_v1 = vmov 0.0   ;;  %v117_v2 = vld [vmem:[#allocation6 + $0xf8] sm:$0xff]  ;;  %v116_v3 = vld [vmem:[#allocation6 + $0xf0] sm:$0xff]  ;;  %vm860_vm0 = vmmov 0  }
  0x2c   :  { %194 = vmatprep.mubr.f32.mxu0 %v859_v1  ;;  %v115_v4 = vld [vmem:[#allocation6 + $0xe8] sm:$0xff]  ;;  %130 = vmatprep.subr.mxu0 %v117_v2  ;;  %v114_v5 = vld [vmem:[#allocation6 + $0xe0] sm:$0xff]  ;;  %v113_v6 = vld [vmem:[#allocation6 + $0xd8] sm:$0xff]  ;;  %s862_s22 = smov [#allocation9]  }
  0x2d   :  { %131 = vmatpush1.msra.mxu0 %v116_v3  ;;  %v112_v7 = vld [vmem:[#allocation6 + $0xd0] sm:$0xff]  ;;  %v111_v8 = vld [vmem:[#allocation6 + $0xc8] sm:$0xff]  ;;  %v110_v9 = vld [vmem:[#allocation6 + $0xc0] sm:$0xff]  ;;  %s611_s23 = sshll.u32 %s862_s22, 4  ;;  %s612_s23 = int_to_ptr.vmem [resolvable:$true] %s611_s23 }
  0x2e   :  { %132 = vmatprep.subr.mxu0 %v115_v4  ;;  %v109_v10 = vld [vmem:[#allocation6 + $0xb8] sm:$0xff]  ;;  %v108_v11 = vld [vmem:[#allocation6 + $0xb0] sm:$0xff]  ;;  %v107_v12 = vld [vmem:[#allocation6 + $0xa8] sm:$0xff]  ;;  %s826_s24 = scalar_lea.vmem %s612_s23, 16  ;;  %s830_s25 = scalar_lea.vmem %s612_s23, 32 }
  0x2f   :  { %133 = vmatpush1.msra.mxu0 %v114_v5  ;;  %v106_v13 = vld [vmem:[#allocation6 + $0xa0] sm:$0xff]  ;;  %v105_v14 = vld [vmem:[#allocation6 + $0x98] sm:$0xff]  ;;  %v104_v15 = vld [vmem:[#allocation6 + $0x90] sm:$0xff]  ;;  %p827_p1 = scmp.ne.s32.totalorder %s612_s23, %s826_s24  ;;  %p831_p2 = scmp.lt.s32.totalorder %s612_s23, %s612_s23 }
  0x30   :  { %134 = vmatprep.subr.mxu0 %v113_v6  ;;  %v103_v16 = vld [vmem:[#allocation6 + $0x88] sm:$0xff]  ;;  %v102_v17 = vld [vmem:[#allocation6 + $0x80] sm:$0xff]  ;;  %v101_v18 = vld [vmem:[#allocation6 + $0x78] sm:$0xff]  ;;  %p832_p3 = scmp.lt.s32.totalorder %s830_s25, %s826_s24 }
  0x31   :  { %135 = vmatpush1.msra.mxu0 %v112_v7  ;;  %v100_v19 = vld [vmem:[#allocation6 + $0x70] sm:$0xff]  ;;  %v99_v20 = vld [vmem:[#allocation6 + $0x68] sm:$0xff]  ;;  %v354_v21 = vld [vmem:[#allocation8 + $0xf8] sm:$0xff] }
  0x32   :  { %136 = vmatprep.subr.mxu0 %v111_v8  ;;  %v338_v22 = vld [vmem:[#allocation8 + $0x78] sm:$0xff]  ;;  %v353_v23 = vld [vmem:[#allocation8 + $0xf0] sm:$0xff]  ;;  %v98_v24 = vld [vmem:[#allocation6 + $0x60] sm:$0xff]  ;;  %622 = vmatprep.subr.mxu1 %v354_v21  ;;  %p833_p4 = por %p832_p3, %p831_p2 }
  0x33   :  { %137 = vmatpush1.msra.mxu0 %v110_v9  ;;  %v337_v25 = vld [vmem:[#allocation8 + $0x70] sm:$0xff]  ;;  %v97_v26 = vld [vmem:[#allocation6 + $0x58] sm:$0xff]  ;;  %623 = vmatpush3.msra.mxu1 %v338_v22  ;;  %v352_v27 = vld [vmem:[#allocation8 + $0xe8] sm:$0xff] }
  0x34   :  { %138 = vmatprep.subr.mxu0 %v109_v10  ;;  %v96_v28 = vld [vmem:[#allocation6 + $0x50] sm:$0xff]  ;;  %624 = vmatprep.subr.mxu1 %v353_v23  ;;  %v336_v29 = vld [vmem:[#allocation8 + $0x68] sm:$0xff]  ;;  %v351_v31 = vld [vmem:[#allocation8 + $0xe0] sm:$0xff]  ;;  %p834_p5 = pnand %p833_p4, %p827_p1 }
  0x35   :  { %139 = vmatpush1.msra.mxu0 %v108_v11  ;;  %v95_v30 = vld [vmem:[#allocation6 + $0x48] sm:$0xff]  ;;  %625 = vmatpush3.msra.mxu1 %v337_v25  ;;  %v94_v32 = vld [vmem:[#allocation6 + $0x40] sm:$0xff]  ;;  %v93_v34 = vld [vmem:[#allocation6 + $0x38] sm:$0xff] }
  0x36   :  { %140 = vmatprep.subr.mxu0 %v107_v12  ;;  %626 = vmatprep.subr.mxu1 %v352_v27  ;;  %v335_v33 = vld [vmem:[#allocation8 + $0x60] sm:$0xff]  ;;  %v350_v35 = vld [vmem:[#allocation8 + $0xd8] sm:$0xff]  ;;  %v92_v36 = vld [vmem:[#allocation6 + $0x30] sm:$0xff] }
  0x37   :  { %141 = vmatpush1.msra.mxu0 %v106_v13  ;;  %627 = vmatpush3.msra.mxu1 %v336_v29  ;;  %v334_v37 = vld [vmem:[#allocation8 + $0x58] sm:$0xff]  ;;  %v91_v38 = vld [vmem:[#allocation6 + $0x28] sm:$0xff]  ;;  %v349_v39 = vld [vmem:[#allocation8 + $0xd0] sm:$0xff] }
  0x38   :  { %142 = vmatprep.subr.mxu0 %v105_v14  ;;  %628 = vmatprep.subr.mxu1 %v351_v31  ;;  %v90_v40 = vld [vmem:[#allocation6 + $0x20] sm:$0xff]  ;;  %v333_v41 = vld [vmem:[#allocation8 + $0x50] sm:$0xff]  ;;  %v89_v42 = vld [vmem:[#allocation6 + $0x18] sm:$0xff] }
  0x39   :  { %143 = vmatpush1.msra.mxu0 %v104_v15  ;;  %629 = vmatpush3.msra.mxu1 %v335_v33  ;;  %v348_v43 = vld [vmem:[#allocation8 + $0xc8] sm:$0xff]  ;;  %v88_v44 = vld [vmem:[#allocation6 + $0x10] sm:$0xff]  ;;  %v347_v47 = vld [vmem:[#allocation8 + $0xc0] sm:$0xff] }
  0x3a   :  { %144 = vmatprep.subr.mxu0 %v103_v16  ;;  %630 = vmatprep.subr.mxu1 %v350_v35  ;;  %v332_v45 = vld [vmem:[#allocation8 + $0x48] sm:$0xff]  ;;  %v86_v48 = vld [vmem:[#allocation6] sm:$0xff]  ;;  %v346_v51 = vld [vmem:[#allocation8 + $0xb8] sm:$0xff] }
  0x3b   :  { %145 = vmatpush1.msra.mxu0 %v102_v17  ;;  %631 = vmatpush3.msra.mxu1 %v334_v37  ;;  %v87_v46 = vld [vmem:[#allocation6 + $0x8] sm:$0xff]  ;;  %v331_v49 = vld [vmem:[#allocation8 + $0x40] sm:$0xff]  ;;  %v330_v52 = vld [vmem:[#allocation8 + $0x38] sm:$0xff] }
  0x3c   :  { %146 = vmatprep.subr.mxu0 %v101_v18  ;;  %632 = vmatprep.subr.mxu1 %v349_v39  ;;  %v70_v50 = vld [vmem:[#allocation3] sm:$0xff]  ;;  %v345_v53 = vld [vmem:[#allocation8 + $0xb0] sm:$0xff]  ;;  %v71_v55 = vld [vmem:[#allocation3 + $0x8] sm:$0xff] }
  0x3d   :  { %147 = vmatpush1.msra.mxu0 %v100_v19  ;;  %633 = vmatpush3.msra.mxu1 %v333_v41  ;;  %v329_v54 = vld [vmem:[#allocation8 + $0x30] sm:$0xff]  ;;  %v344_v56 = vld [vmem:[#allocation8 + $0xa8] sm:$0xff]  ;;  %v343_v58 = vld [vmem:[#allocation8 + $0xa0] sm:$0xff]  ;;  %v120_v19 = vlaneseq }
  0x3e   :  { %148 = vmatprep.subr.mxu0 %v99_v20  ;;  %634 = vmatprep.subr.mxu1 %v348_v43  ;;  %v328_v57 = vld [vmem:[#allocation8 + $0x28] sm:$0xff]  ;;  %v327_v59 = vld [vmem:[#allocation8 + $0x20] sm:$0xff]  ;;  %v72_v60 = vld [vmem:[#allocation3 + $0x10] sm:$0xff] }
  0x3f   :  { %149 = vmatpush1.msra.mxu0 %v98_v24  ;;  %635 = vmatpush3.msra.mxu1 %v332_v45  ;;  %v73_v61 = vld [vmem:[#allocation3 + $0x18] sm:$0xff]  ;;  %v74_v62 = vld [vmem:[#allocation3 + $0x20] sm:$0xff]  ;;  %v75_v63 = vld [vmem:[#allocation3 + $0x28] sm:$0xff]  ;;  %v932_v20 = vshrl.u32 %v120_v19, 7 }
  0x40   :  { %150 = vmatprep.subr.mxu0 %v97_v26  ;;  %636 = vmatprep.subr.mxu1 %v347_v47  ;;  %v76_v0 = vld [vmem:[#allocation3 + $0x30] sm:$0xff]  ;;  %v77_v2 = vld [vmem:[#allocation3 + $0x38] sm:$0xff]  ;;  %v78_v3 = vld [vmem:[#allocation3 + $0x40] sm:$0xff] }
  0x41   :  { %151 = vmatpush1.msra.mxu0 %v96_v28  ;;  %637 = vmatpush3.msra.mxu1 %v331_v49  ;;  %v79_v4 = vld [vmem:[#allocation3 + $0x48] sm:$0xff]  ;;  %v80_v5 = vld [vmem:[#allocation3 + $0x50] sm:$0xff]  ;;  %v81_v6 = vld [vmem:[#allocation3 + $0x58] sm:$0xff]  ;;  %v122_v21 = vsub.s32 0, %v932_v20  ;;  %v126_v23 = vsub.s32 1, %v932_v20 }
  0x42   :  { %152 = vmatprep.subr.mxu0 %v95_v30  ;;  %638 = vmatprep.subr.mxu1 %v346_v51  ;;  %v82_v7 = vld [vmem:[#allocation3 + $0x60] sm:$0xff]  ;;  %v83_v8 = vld [vmem:[#allocation3 + $0x68] sm:$0xff]  ;;  %v84_v9 = vld [vmem:[#allocation3 + $0x70] sm:$0xff] }
  0x43   :  { %153 = vmatpush1.msra.mxu0 %v94_v32  ;;  %639 = vmatpush3.msra.mxu1 %v330_v52  ;;  %v85_v10 = vld [vmem:[#allocation3 + $0x78] sm:$0xff]  ;;  %v341_v13 = vld [vmem:[#allocation8 + $0x90] sm:$0xff]  ;;  %v340_v15 = vld [vmem:[#allocation8 + $0x88] sm:$0xff] }
  0x44   :  { %154 = vmatprep.subr.mxu0 %v93_v34  ;;  %640 = vmatprep.subr.mxu1 %v345_v53  ;;  %v342_v11 = vld [vmem:[#allocation8 + $0x98] sm:$0xff]  ;;  %v325_v14 = vld [vmem:[#allocation8 + $0x10] sm:$0xff]  ;;  %v324_v16 = vld [vmem:[#allocation8 + $0x8] sm:$0xff] }
  0x45   :  { %155 = vmatpush1.msra.mxu0 %v92_v36  ;;  %641 = vmatpush3.msra.mxu1 %v329_v54  ;;  %v326_v12 = vld [vmem:[#allocation8 + $0x18] sm:$0xff]  ;;  %v339_v17 = vld [vmem:[#allocation8 + $0x80] sm:$0xff] }
  0x46   :  { %156 = vmatprep.subr.mxu0 %v91_v38  ;;  %642 = vmatprep.subr.mxu1 %v344_v56  ;;  %v323_v18 = vld [vmem:[#allocation8] sm:$0xff] }
  0x47   :  { %157 = vmatpush1.msra.mxu0 %v90_v40  ;;  %643 = vmatpush3.msra.mxu1 %v328_v57  ;;  %v118_v22 = vld [vmem:[%s1042_s2] sm:$0x3] }
  0x48   :  { %158 = vmatprep.subr.mxu0 %v89_v42  ;;  %644 = vmatprep.subr.mxu1 %v343_v58  ;;  %v941_v24 = vrot.slane %v118_v22, %v122_v21  ;;  %v943_v25 = vrot.slane %v118_v22, %v126_v23 }
  0x49   :  { %159 = vmatpush1.msra.mxu0 %v88_v44  ;;  %645 = vmatpush3.msra.mxu1 %v327_v59 }
  0x4a   :  { %160 = vmatprep.subr.mxu0 %v87_v46  ;;  %646 = vmatprep.subr.mxu1 %v342_v11 }
  0x4b   :  { %161 = vmatpush1.msra.mxu0 %v86_v48  ;;  %647 = vmatpush3.msra.mxu1 %v326_v12 }
  0x4c   :  { %195 = vmatmul.mubr.f32.vlgmr.msra.gmra.mxu0 %v70_v50  ;;  %719 = vmatprep.subr.mxu0 %v859_v1 }
  0x4d   :  { %200 = vmatprep.mubr.f32.mxu0 %v859_v1  ;;  %648 = vmatprep.subr.mxu1 %v341_v13 }
  0x4e   :  { %649 = vmatpush3.msra.mxu1 %v325_v14 }
  0x4f   :  { %650 = vmatprep.subr.mxu1 %v340_v15 }
  0x50   :  { %201 = vmatmul.mubr.f32.gmra.mxu0 %v71_v55  ;;  %651 = vmatpush3.msra.mxu1 %v324_v16 }
  0x51   :  { %206 = vmatprep.mubr.f32.mxu0 %v859_v1  ;;  %652 = vmatprep.subr.mxu1 %v339_v17 }
  0x52   :  { %653 = vmatpush3.msra.mxu1 %v323_v18 }
  0x54   :  { %207 = vmatmul.mubr.f32.gmra.mxu0 %v72_v60 }
  0x55   :  { %212 = vmatprep.mubr.f32.mxu0 %v859_v1 }
  0x58   :  { %213 = vmatmul.mubr.f32.gmra.mxu0 %v73_v61 }
  0x59   :  { %218 = vmatprep.mubr.f32.mxu0 %v859_v1 }
  0x5c   :  { %219 = vmatmul.mubr.f32.gmra.mxu0 %v74_v62 }
  0x5d   :  { %224 = vmatprep.mubr.f32.mxu0 %v859_v1 }
  0x60   :  { %225 = vmatmul.mubr.f32.gmra.mxu0 %v75_v63 }
  0x61   :  { %230 = vmatprep.mubr.f32.mxu0 %v859_v1 }
  0x64   :  { %231 = vmatmul.mubr.f32.gmra.mxu0 %v76_v0 }
  0x65   :  { %236 = vmatprep.mubr.f32.mxu0 %v859_v1 }
  0x68   :  { %237 = vmatmul.mubr.f32.gmra.mxu0 %v77_v2 }
  0x69   :  { %242 = vmatprep.mubr.f32.mxu0 %v859_v1 }
  0x6c   :  { %243 = vmatmul.mubr.f32.gmra.mxu0 %v78_v3 }
  0x6d   :  { %248 = vmatprep.mubr.f32.mxu0 %v859_v1 }
  0x70   :  { %249 = vmatmul.mubr.f32.gmra.mxu0 %v79_v4 }
  0x71   :  { %254 = vmatprep.mubr.f32.mxu0 %v859_v1 }
  0x74   :  { %255 = vmatmul.mubr.f32.gmra.mxu0 %v80_v5 }
  0x75   :  { %260 = vmatprep.mubr.f32.mxu0 %v859_v1 }
  0x78   :  { %261 = vmatmul.mubr.f32.gmra.mxu0 %v81_v6 }
  0x79   :  { %266 = vmatprep.mubr.f32.mxu0 %v859_v1 }
  0x7c   :  { %267 = vmatmul.mubr.f32.gmra.mxu0 %v82_v7 }
  0x7d   :  { %272 = vmatprep.mubr.f32.mxu0 %v859_v1 }
  0x80   :  { %273 = vmatmul.mubr.f32.gmra.mxu0 %v83_v8 }
  0x81   :  { %278 = vmatprep.mubr.f32.mxu0 %v859_v1 }
  0x84   :  { %279 = vmatmul.mubr.f32.gmra.mxu0 %v84_v9 }
  0x85   :  { %284 = vmatprep.mubr.f32.mxu0 %v859_v1 }
  0x88   :  { %285 = vmatmul.mubr.f32.gmra.mxu0 %v85_v10 }
  0x89   :  { %751 = vmatprep.mubr.msk.f32.mxu0 %vm860_vm0, %v859_v1 }
 0x10c   :  { %v196_v26 = vpop.f32.mrf.mxu0 }
 0x10d   :  { %v197_v27 = vadd.f32 %v196_v26, %v941_v24 }
 0x10e   :  { %v198_v28 = vpop.f32.mrf.mxu0 }
 0x10f   :  { %v199_v29 = vadd.f32 %v198_v28, %v943_v25  ;;  %v291_v32 = vmax.f32 %v197_v27, 0.0 }
 0x110   :  { %v202_v30 = vpop.f32.mrf.mxu0 }
 0x111   :  { %v292_v31 = vmax.f32 %v199_v29, 0.0  ;;  %v203_v33 = vadd.f32 %v202_v30, %v941_v24 }
 0x112   :  { %v204_v34 = vpop.f32.mrf.mxu0 }
 0x113   :  { %v205_v35 = vadd.f32 %v204_v34, %v943_v25  ;;  %426 = vmatprep.mubr.f32.mxu1 %v292_v31  ;;  %v293_v38 = vmax.f32 %v203_v33, 0.0 }
 0x114   :  { %v208_v36 = vpop.f32.mrf.mxu0  ;;  %427 = vmatmul.mubr.f32.vlgmr.msra.gmra.mxu1 %v291_v32 }
 0x115   :  { %v294_v37 = vmax.f32 %v205_v35, 0.0  ;;  %v209_v39 = vadd.f32 %v208_v36, %v941_v24 }
 0x116   :  { %v210_v40 = vpop.f32.mrf.mxu0 }
 0x117   :  { %v211_v41 = vadd.f32 %v210_v40, %v943_v25  ;;  %431 = vmatprep.mubr.f32.mxu1 %v294_v37  ;;  %v295_v44 = vmax.f32 %v209_v39, 0.0 }
 0x118   :  { %v214_v42 = vpop.f32.mrf.mxu0  ;;  %432 = vmatmul.mubr.f32.gmra.mxu1 %v293_v38 }
 0x119   :  { %v296_v43 = vmax.f32 %v211_v41, 0.0  ;;  %v215_v45 = vadd.f32 %v214_v42, %v941_v24 }
 0x11a   :  { %v216_v46 = vpop.f32.mrf.mxu0 }
 0x11b   :  { %v217_v47 = vadd.f32 %v216_v46, %v943_v25  ;;  %436 = vmatprep.mubr.f32.mxu1 %v296_v43  ;;  %v297_v50 = vmax.f32 %v215_v45, 0.0 }
 0x11c   :  { %v220_v48 = vpop.f32.mrf.mxu0  ;;  %437 = vmatmul.mubr.f32.gmra.mxu1 %v295_v44 }
 0x11d   :  { %v298_v49 = vmax.f32 %v217_v47, 0.0  ;;  %v221_v51 = vadd.f32 %v220_v48, %v941_v24 }
 0x11e   :  { %v222_v52 = vpop.f32.mrf.mxu0 }
 0x11f   :  { %v223_v53 = vadd.f32 %v222_v52, %v943_v25  ;;  %441 = vmatprep.mubr.f32.mxu1 %v298_v49  ;;  %v299_v56 = vmax.f32 %v221_v51, 0.0 }
 0x120   :  { %v226_v54 = vpop.f32.mrf.mxu0  ;;  %442 = vmatmul.mubr.f32.gmra.mxu1 %v297_v50 }
 0x121   :  { %v300_v55 = vmax.f32 %v223_v53, 0.0  ;;  %v227_v57 = vadd.f32 %v226_v54, %v941_v24 }
 0x122   :  { %v228_v58 = vpop.f32.mrf.mxu0 }
 0x123   :  { %v229_v59 = vadd.f32 %v228_v58, %v943_v25  ;;  %446 = vmatprep.mubr.f32.mxu1 %v300_v55  ;;  %v301_v62 = vmax.f32 %v227_v57, 0.0 }
 0x124   :  { %v232_v60 = vpop.f32.mrf.mxu0  ;;  %447 = vmatmul.mubr.f32.gmra.mxu1 %v299_v56 }
 0x125   :  { %v302_v61 = vmax.f32 %v229_v59, 0.0  ;;  %v233_v63 = vadd.f32 %v232_v60, %v941_v24 }
 0x126   :  { %v234_v0 = vpop.f32.mrf.mxu0 }
 0x127   :  { %v235_v2 = vadd.f32 %v234_v0, %v943_v25  ;;  %451 = vmatprep.mubr.f32.mxu1 %v302_v61  ;;  %v303_v5 = vmax.f32 %v233_v63, 0.0 }
 0x128   :  { %v238_v3 = vpop.f32.mrf.mxu0  ;;  %452 = vmatmul.mubr.f32.gmra.mxu1 %v301_v62 }
 0x129   :  { %v304_v4 = vmax.f32 %v235_v2, 0.0  ;;  %v239_v6 = vadd.f32 %v238_v3, %v941_v24 }
 0x12a   :  { %v240_v7 = vpop.f32.mrf.mxu0 }
 0x12b   :  { %v241_v8 = vadd.f32 %v240_v7, %v943_v25  ;;  %456 = vmatprep.mubr.f32.mxu1 %v304_v4  ;;  %v305_v11 = vmax.f32 %v239_v6, 0.0  ;;  %v524_v4 = vld [vmem:[#allocation2] sm:$0x1] }
 0x12c   :  { %v244_v9 = vpop.f32.mrf.mxu0  ;;  %457 = vmatmul.mubr.f32.gmra.mxu1 %v303_v5  ;;  %v861_v5 = vmov 0  }
 0x12d   :  { %v306_v10 = vmax.f32 %v241_v8, 0.0  ;;  %v245_v12 = vadd.f32 %v244_v9, %v941_v24  ;;  %765 = vset.pattern.permute.xlu0 %v861_v5 }
 0x12e   :  { %v246_v13 = vpop.f32.mrf.mxu0  ;;  %527 = vperm.xlu0 %765, %v524_v4  }
 0x12f   :  { %v247_v14 = vadd.f32 %v246_v13, %v943_v25  ;;  %461 = vmatprep.mubr.f32.mxu1 %v306_v10  ;;  %v307_v17 = vmax.f32 %v245_v12, 0.0 }
 0x130   :  { %v250_v15 = vpop.f32.mrf.mxu0  ;;  %462 = vmatmul.mubr.f32.gmra.mxu1 %v305_v11 }
 0x131   :  { %v308_v16 = vmax.f32 %v247_v14, 0.0  ;;  %v251_v18 = vadd.f32 %v250_v15, %v941_v24 }
 0x132   :  { %v252_v19 = vpop.f32.mrf.mxu0 }
 0x133   :  { %v253_v22 = vadd.f32 %v252_v19, %v943_v25  ;;  %466 = vmatprep.mubr.f32.mxu1 %v308_v16  ;;  %v309_v27 = vmax.f32 %v251_v18, 0.0 }
 0x134   :  { %v256_v23 = vpop.f32.mrf.mxu0  ;;  %467 = vmatmul.mubr.f32.gmra.mxu1 %v307_v17 }
 0x135   :  { %v310_v26 = vmax.f32 %v253_v22, 0.0  ;;  %v257_v28 = vadd.f32 %v256_v23, %v941_v24 }
 0x136   :  { %v258_v29 = vpop.f32.mrf.mxu0 }
 0x137   :  { %v259_v30 = vadd.f32 %v258_v29, %v943_v25  ;;  %471 = vmatprep.mubr.f32.mxu1 %v310_v26  ;;  %v311_v33 = vmax.f32 %v257_v28, 0.0 }
 0x138   :  { %v262_v31 = vpop.f32.mrf.mxu0  ;;  %472 = vmatmul.mubr.f32.gmra.mxu1 %v309_v27 }
 0x139   :  { %v312_v32 = vmax.f32 %v259_v30, 0.0  ;;  %v263_v34 = vadd.f32 %v262_v31, %v941_v24 }
 0x13a   :  { %v264_v35 = vpop.f32.mrf.mxu0 }
 0x13b   :  { %v265_v36 = vadd.f32 %v264_v35, %v943_v25  ;;  %476 = vmatprep.mubr.f32.mxu1 %v312_v32  ;;  %v313_v39 = vmax.f32 %v263_v34, 0.0 }
 0x13c   :  { %v268_v37 = vpop.f32.mrf.mxu0  ;;  %477 = vmatmul.mubr.f32.gmra.mxu1 %v311_v33 }
 0x13d   :  { %v314_v38 = vmax.f32 %v265_v36, 0.0  ;;  %v269_v40 = vadd.f32 %v268_v37, %v941_v24 }
 0x13e   :  { %v270_v41 = vpop.f32.mrf.mxu0 }
 0x13f   :  { %v271_v42 = vadd.f32 %v270_v41, %v943_v25  ;;  %481 = vmatprep.mubr.f32.mxu1 %v314_v38  ;;  %v315_v45 = vmax.f32 %v269_v40, 0.0 }
 0x140   :  { %v274_v43 = vpop.f32.mrf.mxu0  ;;  %482 = vmatmul.mubr.f32.gmra.mxu1 %v313_v39 }
 0x141   :  { %v316_v44 = vmax.f32 %v271_v42, 0.0  ;;  %v275_v46 = vadd.f32 %v274_v43, %v941_v24 }
 0x142   :  { %v276_v47 = vpop.f32.mrf.mxu0 }
 0x143   :  { %v277_v48 = vadd.f32 %v276_v47, %v943_v25  ;;  %486 = vmatprep.mubr.f32.mxu1 %v316_v44  ;;  %v317_v51 = vmax.f32 %v275_v46, 0.0  ;;  %v993_v46 = vld [vmem:[%s1044_s4] ss:$0 sm:$0xff] }
 0x144   :  { %v280_v49 = vpop.f32.mrf.mxu0  ;;  %487 = vmatmul.mubr.f32.gmra.mxu1 %v315_v45 }
 0x145   :  { %v318_v50 = vmax.f32 %v277_v48, 0.0  ;;  %v281_v52 = vadd.f32 %v280_v49, %v941_v24 }
 0x146   :  { %v282_v53 = vpop.f32.mrf.mxu0 }
 0x147   :  { %v283_v54 = vadd.f32 %v282_v53, %v943_v25  ;;  %491 = vmatprep.mubr.f32.mxu1 %v318_v50  ;;  %v319_v57 = vmax.f32 %v281_v52, 0.0 }
 0x148   :  { %v286_v55 = vpop.f32.mrf.mxu0  ;;  %492 = vmatmul.mubr.f32.gmra.mxu1 %v317_v51 }
 0x149   :  { %v320_v56 = vmax.f32 %v283_v54, 0.0  ;;  %v287_v58 = vadd.f32 %v286_v55, %v941_v24 }
 0x14a   :  { %v288_v59 = vpop.f32.mrf.mxu0 }
 0x14b   :  { %v289_v60 = vadd.f32 %v288_v59, %v943_v25  ;;  %496 = vmatprep.mubr.f32.mxu1 %v320_v56  ;;  %v321_v62 = vmax.f32 %v287_v58, 0.0 }
 0x14c   :  { %497 = vmatmul.mubr.f32.gmra.mxu1 %v319_v57 }
 0x14d   :  { %v322_v61 = vmax.f32 %v289_v60, 0.0 }
 0x14f   :  { %501 = vmatprep.mubr.f32.mxu1 %v322_v61 }
 0x150   :  { %502 = vmatmul.mubr.f32.gmra.mxu1 %v321_v62 }
 0x1d4   :  { %v654_v63 = vpop.f32.mrf.mxu1 }
 0x1d6   :  { %v655_v0 = vpop.f32.mrf.mxu1 }
 0x1d7   :  { %v978_v2 = vadd.f32 %v655_v0, %v654_v63 }
 0x1d8   :  { %v657_v3 = vpop.f32.mrf.mxu1 }
 0x1da   :  { %v658_v24 = vpop.f32.mrf.mxu1 }
 0x1db   :  { %v980_v25 = vadd.f32 %v658_v24, %v657_v3 }
 0x1dc   :  { %v660_v6 = vpop.f32.mrf.mxu1 }
 0x1de   :  { %v661_v7 = vpop.f32.mrf.mxu1 }
 0x1df   :  { %v982_v8 = vadd.f32 %v661_v7, %v660_v6 }
 0x1e0   :  { %v663_v9 = vpop.f32.mrf.mxu1 }
 0x1e2   :  { %v664_v10 = vpop.f32.mrf.mxu1 }
 0x1e3   :  { %v984_v11 = vadd.f32 %v664_v10, %v663_v9 }
 0x1e4   :  { %v666_v12 = vpop.f32.mrf.mxu1 }
 0x1e6   :  { %v667_v13 = vpop.f32.mrf.mxu1 }
 0x1e7   :  { %v986_v14 = vadd.f32 %v667_v13, %v666_v12 }
 0x1e8   :  { %v669_v15 = vpop.f32.mrf.mxu1 }
 0x1e9   :  { %v449_v13 = vadd.f32 %v986_v14, %v993_v46  ;;  %v434_v14 = vadd.f32 %v980_v25, %v993_v46 }
 0x1ea   :  { %v670_v16 = vpop.f32.mrf.mxu1 }
 0x1eb   :  { %v988_v17 = vadd.f32 %v670_v16, %v669_v15  ;;  %v444_v16 = vadd.f32 %v984_v11, %v993_v46  ;;  %v429_v11 = vadd.f32 %v978_v2, %v993_v46 }
 0x1ec   :  { %v672_v18 = vpop.f32.mrf.mxu1 }
 0x1ed   :  { %v454_v10 = vadd.f32 %v988_v17, %v993_v46  ;;  %v439_v17 = vadd.f32 %v982_v8, %v993_v46  ;;  %v523_v8 = vld [vmem:[%s1045_s5] sm:$0x1] }
 0x1ee   :  { %v673_v19 = vpop.f32.mrf.mxu1 }
 0x1ef   :  { %v674_v22 = vadd.f32 %v673_v19, %v672_v18  ;;  %v512_v15 = vmax.f32 %v454_v10, 0.0  ;;  %v511_v18 = vmax.f32 %v449_v13, 0.0  ;;  %v510_v19 = vmax.f32 %v444_v16, 0.0 }
 0x1f0   :  { %v675_v23 = vpop.f32.mrf.mxu1 }
 0x1f1   :  { %v459_v7 = vadd.f32 %v674_v22, %v993_v46  ;;  %v509_v22 = vmax.f32 %v439_v17, 0.0 }
 0x1f2   :  { %v676_v26 = vpop.f32.mrf.mxu1 }
 0x1f3   :  { %v677_v27 = vadd.f32 %v676_v26, %v675_v23  ;;  %v513_v12 = vmax.f32 %v459_v7, 0.0  ;;  %v508_v23 = vmax.f32 %v434_v14, 0.0  ;;  %v507_v26 = vmax.f32 %v429_v11, 0.0 }
 0x1f4   :  { %v678_v28 = vpop.f32.mrf.mxu1 }
 0x1f5   :  { %v464_v24 = vadd.f32 %v677_v27, %v993_v46  ;;  %v528_v27 = vpop.permute.xlu0 %527 }
 0x1f6   :  { %v679_v29 = vpop.f32.mrf.mxu1  ;;  %v533_v25 = vrot.slane %v528_v27, %v122_v21 }
 0x1f7   :  { %v680_v63 = vadd.f32 %v679_v29, %v678_v28  ;;  %v514_v9 = vmax.f32 %v464_v24, 0.0 }
 0x1f8   :  { %v681_v30 = vpop.f32.mrf.mxu1 }
 0x1f9   :  { %v469_v4 = vadd.f32 %v680_v63, %v993_v46 }
 0x1fa   :  { %v682_v31 = vpop.f32.mrf.mxu1 }
 0x1fb   :  { %v683_v60 = vadd.f32 %v682_v31, %v681_v30  ;;  %v515_v6 = vmax.f32 %v469_v4, 0.0 }
 0x1fc   :  { %v684_v32 = vpop.f32.mrf.mxu1 }
 0x1fd   :  { %v474_v0 = vadd.f32 %v683_v60, %v993_v46 }
 0x1fe   :  { %v685_v33 = vpop.f32.mrf.mxu1 }
 0x1ff   :  { %v686_v57 = vadd.f32 %v685_v33, %v684_v32  ;;  %v516_v5 = vmax.f32 %v474_v0, 0.0 }
 0x200   :  { %v687_v34 = vpop.f32.mrf.mxu1 }
 0x201   :  { %v479_v61 = vadd.f32 %v686_v57, %v993_v46 }
 0x202   :  { %v688_v35 = vpop.f32.mrf.mxu1 }
 0x203   :  { %v689_v54 = vadd.f32 %v688_v35, %v687_v34  ;;  %v517_v3 = vmax.f32 %v479_v61, 0.0 }
 0x204   :  { %v690_v36 = vpop.f32.mrf.mxu1 }
 0x205   :  { %v484_v58 = vadd.f32 %v689_v54, %v993_v46 }
 0x206   :  { %v691_v37 = vpop.f32.mrf.mxu1 }
 0x207   :  { %v692_v51 = vadd.f32 %v691_v37, %v690_v36  ;;  %v518_v62 = vmax.f32 %v484_v58, 0.0 }
 0x208   :  { %v693_v38 = vpop.f32.mrf.mxu1 }
 0x209   :  { %v489_v55 = vadd.f32 %v692_v51, %v993_v46 }
 0x20a   :  { %v694_v39 = vpop.f32.mrf.mxu1 }
 0x20b   :  { %v695_v48 = vadd.f32 %v694_v39, %v693_v38  ;;  %v519_v59 = vmax.f32 %v489_v55, 0.0 }
 0x20c   :  { %v696_v40 = vpop.f32.mrf.mxu1 }
 0x20d   :  { %v494_v52 = vadd.f32 %v695_v48, %v993_v46 }
 0x20e   :  { %v697_v41 = vpop.f32.mrf.mxu1 }
 0x20f   :  { %v698_v44 = vadd.f32 %v697_v41, %v696_v40  ;;  %v520_v56 = vmax.f32 %v494_v52, 0.0 }
 0x210   :  { %v699_v42 = vpop.f32.mrf.mxu1 }
 0x211   :  { %v499_v49 = vadd.f32 %v698_v44, %v993_v46 }
 0x212   :  { %v700_v43 = vpop.f32.mrf.mxu1 }
 0x213   :  { %v701_v45 = vadd.f32 %v700_v43, %v699_v42  ;;  %v521_v53 = vmax.f32 %v499_v49, 0.0 }
 0x215   :  { %v504_v47 = vadd.f32 %v701_v45, %v993_v46 }
 0x217   :  { %v522_v50 = vmax.f32 %v504_v47, 0.0 }
 0x219   :  { %720 = vmatpush3.xpose.msra.mxu0 %v522_v50 }
 0x21a   :  { %721 = vmatprep.subr.mxu0 %v859_v1 }
 0x21d   :  { %722 = vmatpush3.xpose.msra.mxu0 %v521_v53 }
 0x21e   :  { %723 = vmatprep.subr.mxu0 %v859_v1 }
 0x221   :  { %724 = vmatpush3.xpose.msra.mxu0 %v520_v56 }
 0x222   :  { %725 = vmatprep.subr.mxu0 %v859_v1 }
 0x225   :  { %726 = vmatpush3.xpose.msra.mxu0 %v519_v59 }
 0x226   :  { %727 = vmatprep.subr.mxu0 %v859_v1 }
 0x229   :  { %728 = vmatpush3.xpose.msra.mxu0 %v518_v62 }
 0x22a   :  { %729 = vmatprep.subr.mxu0 %v859_v1 }
 0x22d   :  { %730 = vmatpush3.xpose.msra.mxu0 %v517_v3 }
 0x22e   :  { %731 = vmatprep.subr.mxu0 %v859_v1 }
 0x231   :  { %732 = vmatpush3.xpose.msra.mxu0 %v516_v5 }
 0x232   :  { %733 = vmatprep.subr.mxu0 %v859_v1 }
 0x235   :  { %734 = vmatpush3.xpose.msra.mxu0 %v515_v6 }
 0x236   :  { %735 = vmatprep.subr.mxu0 %v859_v1 }
 0x239   :  { %736 = vmatpush3.xpose.msra.mxu0 %v514_v9 }
 0x23a   :  { %737 = vmatprep.subr.mxu0 %v859_v1 }
 0x23d   :  { %738 = vmatpush3.xpose.msra.mxu0 %v513_v12 }
 0x23e   :  { %739 = vmatprep.subr.mxu0 %v859_v1 }
 0x241   :  { %740 = vmatpush3.xpose.msra.mxu0 %v512_v15 }
 0x242   :  { %741 = vmatprep.subr.mxu0 %v859_v1 }
 0x245   :  { %742 = vmatpush3.xpose.msra.mxu0 %v511_v18 }
 0x246   :  { %743 = vmatprep.subr.mxu0 %v859_v1 }
 0x249   :  { %744 = vmatpush3.xpose.msra.mxu0 %v510_v19 }
 0x24a   :  { %745 = vmatprep.subr.mxu0 %v859_v1 }
 0x24d   :  { %746 = vmatpush3.xpose.msra.mxu0 %v509_v22 }
 0x24e   :  { %747 = vmatprep.subr.mxu0 %v859_v1 }
 0x251   :  { %748 = vmatpush3.xpose.msra.mxu0 %v508_v23 }
 0x252   :  { %749 = vmatprep.subr.mxu0 %v859_v1 }
 0x255   :  { %750 = vmatpush3.xpose.msra.mxu0 %v507_v26 }
 0x258   :  { %752 = vmatmul.mubr.f32.vlgmr.msra.gmra.mxu0 %v523_v8 }
 0x318   :  { %v600_v28 = vpop.f32.mrf.mxu0 }
 0x319   :  { %v601_v29 = vadd.f32 %v600_v28, %v533_v25 }
 0x31a   :  { %v753_v2 = vpop.f32.mrf.mxu0 }
 0x31b   :  { %604 = vst [vmem:[#allocation9] sm:$0x1] %v601_v29 }
 0x31c   :  { %837 = shalt.err (!%p834_p5)
}
 0x31d   :  { %614 = dma.vmem_to_hbm [thread:$0]  %s612_s23, 16, %s1047_s7, [#allocation5]  }
 0x31e   :  { %850 = dma.done.wait [#allocation5], 16  }
 0x31f   :  { %851 = vsyncadd [#allocation5], 4294967280 }
 0x320   :  { %618 = vsyncpa [#allocation4], 1 }
 0x321   :  { %619 = vsyncpa [#allocation7], 1 }
 0x322   :  { %620 = vsyncpa [#allocation5], 1 }

</bundles_post_ra>
